<compile_context>
chip_gen: v5e
topology: v5e:2x2
jax: 0.10.0
libtpu: 0.0.40
codegen_flags: <defaults>
</compile_context>

<pallas_src>
import jax
import jax.numpy as jnp
from jax.experimental import pallas as pl
from jax.experimental.pallas import tpu as pltpu

BN_EPS = 1e-5
LRELU_SLOPE = 0.01

# Layer hyper-parameters of the PyTorch Encoder.
KERNEL_SIZES = (5, 4, 3, 4)
STRIDES = (5, 2, 1, 1)
# Causal left pads: ConstantPad1d((k-1, 0), 0) before convs 2..4.
CAUSAL_PADS = (0, 3, 2, 3)
K1P = 8  # layer-1 taps padded 5 -> 8 so layer 1 runs as a single MXU matmul


def _make_encoder_kernel(N, C, L1, L2, L3, L4):
    """Builds the fused 4-layer kernel for static shapes (lanes = (batch, chan))."""
    NC = N * C
    L1h = L1 // 2
    # Row offsets of the per-layer fused tap weights inside w_ref.
    OFF2, OFF3, OFF4 = 0, 4 * NC, 7 * NC

    def kernel(x_ref, w1_ref, w_ref, g_ref, b_ref, o_ref, s2_ref, s3_ref, s4_ref):
        f32 = jnp.float32
        bf16 = jnp.bfloat16

        # Zero the fused-tap LHS staging buffers once.  Only the handful of
        # never-overwritten top rows of each tap block strictly need it (they
        # are the causal left padding), but the full clear is ~22 vreg stores
        # total and avoids fiddly masked corner writes.
        s2_ref[...] = jnp.zeros(s2_ref.shape, f32)
        s3_ref[...] = jnp.zeros(s3_ref.shape, f32)
        s4_ref[...] = jnp.zeros(s4_ref.shape, f32)

        def fold(s):
            # s: [1, N*C] per-(batch, channel) row sums.  Add the N lane groups
            # (circular lane rolls by multiples of C) so every lane carries the
            # full per-channel total over all batches.
            t = s
            for m in range(1, N):
                t = t + pltpu.roll(s, shift=m * C, axis=1)
            return t

        def bn_lrelu(y, layer, rows):
            """Training-mode BatchNorm1d (biased variance over (N, rows) per
            channel) fused with LeakyReLU(0.01).  y: [rows, N*C] f32."""
            inv_cnt = 1.0 / float(N * rows)
            sum1 = fold(jnp.sum(y, axis=0, keepdims=True))
            sumsq = fold(jnp.sum(y * y, axis=0, keepdims=True))
            mean = sum1 * inv_cnt
            var = jnp.maximum(sumsq * inv_cnt - mean * mean, 0.0)
            scale = g_ref[layer:layer + 1, :] * jax.lax.rsqrt(var + BN_EPS)
            shift = b_ref[layer:layer + 1, :] - mean * scale
            z = y * scale + shift
            return jnp.maximum(z, LRELU_SLOPE * z)  # LeakyReLU(0.01)

        # ---- layer 1: Conv1d(1->C, k=5, s=5) as ONE block-diagonal MXU matmul:
        #      [L1, N*K1P] @ [N*K1P, N*C].  Rows come in [even t | odd t] order.
        y1 = jnp.dot(x_ref[...], w1_ref[...], preferred_element_type=f32)
        z1 = bn_lrelu(y1, 0, L1)                              # [L1, NC] f32

        # Scatter z1 into layer-2's fused-tap LHS.  Output step t of layer 2
        # reads h1[2t + j - 3]; with even/odd row ordering every tap is a
        # contiguous row slice:
        #   j=0 -> odd rows, shift 2    j=1 -> even rows, shift 1
        #   j=2 -> odd rows, shift 1    j=3 -> even rows, shift 0
        s2_ref[2:L2, 0 * NC:1 * NC] = z1[L1h:L1h + L2 - 2]
        s2_ref[1:L2, 1 * NC:2 * NC] = z1[0:L2 - 1]
        s2_ref[1:L2, 2 * NC:3 * NC] = z1[L1h:L1h + L2 - 1]
        s2_ref[0:L2, 3 * NC:4 * NC] = z1[0:L2]

        # ---- layer 2: Conv1d(C->C, k=4, s=2), causal pad 3: one fused matmul ----
        y2 = jnp.dot(s2_ref[...].astype(bf16), w_ref[OFF2:OFF2 + 4 * NC, :],
                     preferred_element_type=f32)
        z2 = bn_lrelu(y2, 1, L2)                              # [L2, NC] f32

        # Layer-3 fused LHS: output t reads h2[t + j - 2].
        s3_ref[2:L3, 0 * NC:1 * NC] = z2[0:L3 - 2]
        s3_ref[1:L3, 1 * NC:2 * NC] = z2[0:L3 - 1]
        s3_ref[0:L3, 2 * NC:3 * NC] = z2[0:L3]

        # ---- layer 3: Conv1d(C->C, k=3, s=1), causal pad 2 ----
        y3 = jnp.dot(s3_ref[...].astype(bf16), w_ref[OFF3:OFF3 + 3 * NC, :],
                     preferred_element_type=f32)
        z3 = bn_lrelu(y3, 2, L3)                              # [L3, NC] f32

        # Layer-4 fused LHS: output t reads h3[t + j - 3].
        s4_ref[3:L4, 0 * NC:1 * NC] = z3[0:L4 - 3]
        s4_ref[2:L4, 1 * NC:2 * NC] = z3[0:L4 - 2]
        s4_ref[1:L4, 2 * NC:3 * NC] = z3[0:L4 - 1]
        s4_ref[0:L4, 3 * NC:4 * NC] = z3[0:L4]

        # ---- layer 4: Conv1d(C->C, k=4, s=1), causal pad 3 ----
        y4 = jnp.dot(s4_ref[...].astype(bf16), w_ref[OFF4:OFF4 + 4 * NC, :],
                     preferred_element_type=f32)
        o_ref[...] = bn_lrelu(y4, 3, L4)   # [L4, N*C] lane-dense: only HBM write

    return kernel


def encoder_forward(x, params):
    """x: [N, 1, T] -> [N, dim_hidden, L_out] (matches the PyTorch NCL output)."""
    N, c_in, T = x.shape
    assert c_in == 1
    pad0 = (-T) % 5
    Tp = T + pad0
    L1 = Tp // 5
    # TODO(synk): odd L1 (Tp % 10 != 0) would need a tail window in the even/odd
    # split below; not needed for the shapes this module is used with.
    assert L1 % 2 == 0, "fused kernel requires an even number of layer-1 steps"
    L1h = L1 // 2
    L2 = (L1 + CAUSAL_PADS[1] - KERNEL_SIZES[1]) // STRIDES[1] + 1
    L3 = (L2 + CAUSAL_PADS[2] - KERNEL_SIZES[2]) // STRIDES[2] + 1
    L4 = (L3 + CAUSAL_PADS[3] - KERNEL_SIZES[3]) // STRIDES[3] + 1
    assert L2 == L1h and L3 == L2 and L4 == L3

    w1, _, _ = params[0]
    C = w1.shape[0]
    K1 = KERNEL_SIZES[0]
    NC = N * C
    # TODO(synk): for large n_assets, tile batches/rows across a "parallel" grid
    # axis instead of widening the lane packing (block-diag weights grow as N^2).
    assert NC <= 1024, "lane-packed fused kernel expects a small batch"

    # Layer-1 patches: stride == kernel == 5 and C_in == 1, so the "im2col" is a
    # pure reshape (no gather).  Rows are reordered [even t | odd t] so the
    # stride-2 second layer only needs contiguous row slices in-kernel; taps are
    # zero-padded 5 -> K1P and the N batches are packed onto lanes.
    xf = jnp.pad(x.astype(jnp.float32), ((0, 0), (0, 0), (pad0, 0)))[:, 0, :]
    xr = xf.reshape(N, L1h, 2 * K1)
    xw = jnp.concatenate([xr[:, :, 0:K1], xr[:, :, K1:2 * K1]], axis=1)   # [N, L1, 5]
    xw = jnp.pad(xw, ((0, 0), (0, 0), (0, K1P - K1)))                      # [N, L1, 8]
    x_pat = jnp.transpose(xw, (1, 0, 2)).reshape(L1, N * K1P).astype(jnp.bfloat16)

    # Weight packing (wrapper side, one-off):
    #   layer 1:   [N*K1P, N*C] block-diagonal over batches.
    #   layers 2-4: per-layer fused tap matrices [k*N*C, N*C] (each tap a
    #   block-diagonal-over-batch [N*C, N*C]), concatenated row-wise.
    eye_n = jnp.eye(N, dtype=jnp.float32)
    w1_mat = jnp.pad(jnp.transpose(w1[:, 0, :]), ((0, K1P - K1), (0, 0)))   # [K1P, C]
    w1_blk = jnp.kron(eye_n, w1_mat).astype(jnp.bfloat16)                   # [N*K1P, N*C]

    fused = []
    for (w, _, _), k in zip(params[1:], KERNEL_SIZES[1:]):
        for j in range(k):
            fused.append(jnp.kron(eye_n, jnp.transpose(w[:, :, j])))        # [N*C, N*C]
    w_all = jnp.concatenate(fused, axis=0).astype(jnp.bfloat16)             # [11*N*C, N*C]

    g_tiled = jnp.tile(jnp.stack([p[1] for p in params], 0), (1, N)).astype(jnp.float32)
    b_tiled = jnp.tile(jnp.stack([p[2] for p in params], 0), (1, N)).astype(jnp.float32)

    kernel = _make_encoder_kernel(N, C, L1, L2, L3, L4)
    n_tap_rows = sum(KERNEL_SIZES[1:]) * NC

    out_lnc = pl.pallas_call(
        kernel,
        out_shape=jax.ShapeDtypeStruct((L4, NC), jnp.float32),
        grid=(1,),
        in_specs=[
            pl.BlockSpec((L1, N * K1P), lambda i: (0, 0)),
            pl.BlockSpec((N * K1P, NC), lambda i: (0, 0)),
            pl.BlockSpec((n_tap_rows, NC), lambda i: (0, 0)),
            pl.BlockSpec((4, NC), lambda i: (0, 0)),
            pl.BlockSpec((4, NC), lambda i: (0, 0)),
        ],
        out_specs=pl.BlockSpec((L4, NC), lambda i: (0, 0)),
        scratch_shapes=[
            pltpu.VMEM((L2, 4 * NC), jnp.float32),   # fused-tap LHS for layer 2
            pltpu.VMEM((L3, 3 * NC), jnp.float32),   # fused-tap LHS for layer 3
            pltpu.VMEM((L4, 4 * NC), jnp.float32),   # fused-tap LHS for layer 4
        ],
        compiler_params=pltpu.CompilerParams(dimension_semantics=("arbitrary",)),
    )(x_pat, w1_blk, w_all, g_tiled, b_tiled)

    # Un-pack the (batch, channel) lanes and do the single NCL transpose here.
    return jnp.transpose(out_lnc.reshape(L4, N, C), (1, 2, 0))


def init_encoder_params(key, dim_hidden=64):
    """Deterministic synthetic params matching nn.Conv1d / BatchNorm1d shapes."""
    c_ins = (1, dim_hidden, dim_hidden, dim_hidden)
    params = []
    for i in range(4):
        key, wk, gk, bk = jax.random.split(key, 4)
        w = 0.1 * jax.random.normal(wk, (dim_hidden, c_ins[i], KERNEL_SIZES[i]), jnp.float32)
        gamma = 1.0 + 0.1 * jax.random.normal(gk, (dim_hidden,), jnp.float32)
        beta = 0.1 * jax.random.normal(bk, (dim_hidden,), jnp.float32)
        params.append((w, gamma, beta))
    return params


def encoder_reference(x, params):
    """Pure-JAX f32 reference of the PyTorch Encoder forward (training-mode BN)."""
    T = x.shape[-1]
    pads = ((-T) % 5,) + CAUSAL_PADS[1:]
    h = x.astype(jnp.float32)
    for i in range(4):
        w, g, b = params[i]
        h = jnp.pad(h, ((0, 0), (0, 0), (pads[i], 0)))
        y = jax.lax.conv_general_dilated(
            h, w, window_strides=(STRIDES[i],), padding=[(0, 0)],
            dimension_numbers=("NCH", "OIH", "NCH"))
        mean = jnp.mean(y, axis=(0, 2), keepdims=True)
        var = jnp.var(y, axis=(0, 2), keepdims=True)
        y = (y - mean) * jax.lax.rsqrt(var + BN_EPS)
        y = y * g.reshape(1, -1, 1) + b.reshape(1, -1, 1)
        h = jnp.where(y >= 0, y, LRELU_SLOPE * y)
    return h


if __name__ == "__main__":
    key = jax.random.PRNGKey(0)
    key, xk, pk = jax.random.split(key, 3)

    # Small shapes consistent with forward(): [n_assets, 1, n_timesteps].
    n_assets, T = 2, 160
    x = jax.random.normal(xk, (n_assets, 1, T), jnp.float32)

    dim_hidden = 64
    params = init_encoder_params(pk, dim_hidden=dim_hidden)

    out = jax.jit(encoder_forward)(x, params)
    out = jax.block_until_ready(out)

    # T=160 -> L1=32 (k5,s5) -> 16 (pad3,k4,s2) -> 16 -> 16.
    assert out.shape == (n_assets, dim_hidden, 16), out.shape
    assert bool(jnp.all(jnp.isfinite(out)))

    # Pure-JAX f32 reference; tolerance covers the bf16 MXU operands.
    ref = encoder_reference(x, params)
    assert bool(jnp.allclose(out, ref, atol=1e-1, rtol=1e-1)), \
        float(jnp.max(jnp.abs(out - ref)))

    print("KERNEL_OK")
</pallas_src>

<mosaic_0001>
module attributes {stable_mosaic.version = 11 : i64} {
  func.func @kernel(%arg0: i32, %arg1: memref<32x16xbf16, #tpu.memory_space<vmem>>, %arg2: memref<16x128xbf16, #tpu.memory_space<vmem>>, %arg3: memref<1408x128xbf16, #tpu.memory_space<vmem>>, %arg4: memref<4x128xf32, #tpu.memory_space<vmem>>, %arg5: memref<4x128xf32, #tpu.memory_space<vmem>>, %arg6: memref<16x128xf32, #tpu.memory_space<vmem>>, %arg7: memref<16x512xf32, #tpu.memory_space<vmem>>, %arg8: memref<16x384xf32, #tpu.memory_space<vmem>>, %arg9: memref<16x512xf32, #tpu.memory_space<vmem>>) attributes {dimension_semantics = [#tpu.dimension_semantics<arbitrary>], iteration_bounds = array<i64: 1>, scalar_prefetch = 0 : i64, scratch_operands = 3 : i64, tpu.core_type = #tpu.core_type<tc>, window_params = [{pipeline_mode = #tpu.pipeline_mode<synchronous>, transform_indices = @transform_0, window_bounds = array<i64: 32, 16>}, {pipeline_mode = #tpu.pipeline_mode<synchronous>, transform_indices = @transform_1, window_bounds = array<i64: 16, 128>}, {pipeline_mode = #tpu.pipeline_mode<synchronous>, transform_indices = @transform_2, window_bounds = array<i64: 1408, 128>}, {pipeline_mode = #tpu.pipeline_mode<synchronous>, transform_indices = @transform_3, window_bounds = array<i64: 4, 128>}, {pipeline_mode = #tpu.pipeline_mode<synchronous>, transform_indices = @transform_4, window_bounds = array<i64: 4, 128>}, {pipeline_mode = #tpu.pipeline_mode<synchronous>, transform_indices = @transform_5, window_bounds = array<i64: 16, 128>}]} {
    %cst = arith.constant 0.000000e+00 : f32
    %0 = vector.broadcast %cst : f32 to vector<16x512xf32>
    %c0 = arith.constant 0 : index
    %c0_0 = arith.constant 0 : index
    %1 = vector.load %arg7[%c0, %c0_0] : memref<16x512xf32, #tpu.memory_space<vmem>>, vector<16x512xf32>
    tpu.vector_store %arg7[%c0, %c0_0], %0 {strides = array<i32>} : memref<16x512xf32, #tpu.memory_space<vmem>>, vector<16x512xf32>,
    %cst_1 = arith.constant 0.000000e+00 : f32
    %2 = vector.broadcast %cst_1 : f32 to vector<16x384xf32>
    %c0_2 = arith.constant 0 : index
    %c0_3 = arith.constant 0 : index
    %3 = vector.load %arg8[%c0_2, %c0_3] : memref<16x384xf32, #tpu.memory_space<vmem>>, vector<16x384xf32>
    tpu.vector_store %arg8[%c0_2, %c0_3], %2 {strides = array<i32>} : memref<16x384xf32, #tpu.memory_space<vmem>>, vector<16x384xf32>,
    %cst_4 = arith.constant 0.000000e+00 : f32
    %4 = vector.broadcast %cst_4 : f32 to vector<16x512xf32>
    %c0_5 = arith.constant 0 : index
    %c0_6 = arith.constant 0 : index
    %5 = vector.load %arg9[%c0_5, %c0_6] : memref<16x512xf32, #tpu.memory_space<vmem>>, vector<16x512xf32>
    tpu.vector_store %arg9[%c0_5, %c0_6], %4 {strides = array<i32>} : memref<16x512xf32, #tpu.memory_space<vmem>>, vector<16x512xf32>,
    %c0_7 = arith.constant 0 : index
    %c0_8 = arith.constant 0 : index
    %6 = vector.load %arg1[%c0_7, %c0_8] : memref<32x16xbf16, #tpu.memory_space<vmem>>, vector<32x16xbf16>
    %c0_9 = arith.constant 0 : index
    %c0_10 = arith.constant 0 : index
    %7 = vector.load %arg2[%c0_9, %c0_10] : memref<16x128xbf16, #tpu.memory_space<vmem>>, vector<16x128xbf16>
    %cst_11 = arith.constant dense<0.000000e+00> : vector<32x128xf32>
    %8 = tpu.matmul %6, %7, %cst_11 {dimension_numbers = #tpu.dot_dimension_numbers<[1], [0], [0], [1], [0, 0, 1, 1], [], []>} : vector<32x16xbf16>, vector<16x128xbf16>, vector<32x128xf32> -> vector<32x128xf32>
    %cst_12 = arith.constant dense<0.000000e+00> : vector<128xf32>
    %9 = vector.multi_reduction <add>, %8, %cst_12 [0] : vector<32x128xf32> to vector<128xf32>
    %10 = vector.shape_cast %9 : vector<128xf32> to vector<1x128xf32>
    %c64_i32 = arith.constant 64 : i32
    %11 = tpu.dynamic_rotate %10 by %c64_i32 dim 1 : vector<1x128xf32>, i32 -> vector<1x128xf32>
    %12 = arith.addf %10, %11 : vector<1x128xf32>
    %13 = arith.mulf %8, %8 : vector<32x128xf32>
    %cst_13 = arith.constant dense<0.000000e+00> : vector<128xf32>
    %14 = vector.multi_reduction <add>, %13, %cst_13 [0] : vector<32x128xf32> to vector<128xf32>
    %15 = vector.shape_cast %14 : vector<128xf32> to vector<1x128xf32>
    %c64_i32_14 = arith.constant 64 : i32
    %16 = tpu.dynamic_rotate %15 by %c64_i32_14 dim 1 : vector<1x128xf32>, i32 -> vector<1x128xf32>
    %17 = arith.addf %15, %16 : vector<1x128xf32>
    %cst_15 = arith.constant 1.562500e-02 : f32
    %18 = vector.broadcast %cst_15 : f32 to vector<1x128xf32>
    %19 = arith.mulf %12, %18 : vector<1x128xf32>
    %cst_16 = arith.constant 1.562500e-02 : f32
    %20 = vector.broadcast %cst_16 : f32 to vector<1x128xf32>
    %21 = arith.mulf %17, %20 : vector<1x128xf32>
    %22 = arith.mulf %19, %19 : vector<1x128xf32>
    %23 = arith.subf %21, %22 : vector<1x128xf32>
    %cst_17 = arith.constant 0.000000e+00 : f32
    %24 = vector.broadcast %cst_17 : f32 to vector<1x128xf32>
    %25 = arith.maximumf %23, %24 : vector<1x128xf32>
    %c0_18 = arith.constant 0 : index
    %c0_19 = arith.constant 0 : index
    %26 = vector.load %arg4[%c0_18, %c0_19] : memref<4x128xf32, #tpu.memory_space<vmem>>, vector<1x128xf32>
    %cst_20 = arith.constant 9.99999974E-6 : f32
    %27 = vector.broadcast %cst_20 : f32 to vector<1x128xf32>
    %28 = arith.addf %25, %27 : vector<1x128xf32>
    %29 = math.rsqrt %28 : vector<1x128xf32>
    %30 = arith.mulf %26, %29 : vector<1x128xf32>
    %c0_21 = arith.constant 0 : index
    %c0_22 = arith.constant 0 : index
    %31 = vector.load %arg5[%c0_21, %c0_22] : memref<4x128xf32, #tpu.memory_space<vmem>>, vector<1x128xf32>
    %32 = arith.mulf %19, %30 : vector<1x128xf32>
    %33 = arith.subf %31, %32 : vector<1x128xf32>
    %34 = vector.broadcast %30 : vector<1x128xf32> to vector<32x128xf32>
    %35 = arith.mulf %8, %34 : vector<32x128xf32>
    %36 = vector.broadcast %33 : vector<1x128xf32> to vector<32x128xf32>
    %37 = arith.addf %35, %36 : vector<32x128xf32>
    %cst_23 = arith.constant 0.00999999977 : f32
    %38 = vector.broadcast %cst_23 : f32 to vector<32x128xf32>
    %39 = arith.mulf %38, %37 : vector<32x128xf32>
    %40 = arith.maximumf %37, %39 : vector<32x128xf32>
    %41 = vector.extract_strided_slice %40 {offsets = [16, 0], sizes = [14, 128], strides = [1, 1]} : vector<32x128xf32> to vector<14x128xf32>
    %c2 = arith.constant 2 : index
    %c0_24 = arith.constant 0 : index
    %42 = vector.load %arg7[%c2, %c0_24] : memref<16x512xf32, #tpu.memory_space<vmem>>, vector<14x128xf32>
    tpu.vector_store %arg7[%c2, %c0_24], %41 {strides = array<i32>} : memref<16x512xf32, #tpu.memory_space<vmem>>, vector<14x128xf32>,
    %43 = vector.extract_strided_slice %40 {offsets = [0, 0], sizes = [15, 128], strides = [1, 1]} : vector<32x128xf32> to vector<15x128xf32>
    %c1 = arith.constant 1 : index
    %c128 = arith.constant 128 : index
    %44 = vector.load %arg7[%c1, %c128] : memref<16x512xf32, #tpu.memory_space<vmem>>, vector<15x128xf32>
    tpu.vector_store %arg7[%c1, %c128], %43 {strides = array<i32>} : memref<16x512xf32, #tpu.memory_space<vmem>>, vector<15x128xf32>,
    %45 = vector.extract_strided_slice %40 {offsets = [16, 0], sizes = [15, 128], strides = [1, 1]} : vector<32x128xf32> to vector<15x128xf32>
    %c1_25 = arith.constant 1 : index
    %c256 = arith.constant 256 : index
    %46 = vector.load %arg7[%c1_25, %c256] : memref<16x512xf32, #tpu.memory_space<vmem>>, vector<15x128xf32>
    tpu.vector_store %arg7[%c1_25, %c256], %45 {strides = array<i32>} : memref<16x512xf32, #tpu.memory_space<vmem>>, vector<15x128xf32>,
    %47 = vector.extract_strided_slice %40 {offsets = [0, 0], sizes = [16, 128], strides = [1, 1]} : vector<32x128xf32> to vector<16x128xf32>
    %c0_26 = arith.constant 0 : index
    %c384 = arith.constant 384 : index
    %48 = vector.load %arg7[%c0_26, %c384] : memref<16x512xf32, #tpu.memory_space<vmem>>, vector<16x128xf32>
    tpu.vector_store %arg7[%c0_26, %c384], %47 {strides = array<i32>} : memref<16x512xf32, #tpu.memory_space<vmem>>, vector<16x128xf32>,
    %c0_27 = arith.constant 0 : index
    %c0_28 = arith.constant 0 : index
    %49 = vector.load %arg7[%c0_27, %c0_28] : memref<16x512xf32, #tpu.memory_space<vmem>>, vector<16x512xf32>
    %50 = arith.truncf %49 : vector<16x512xf32> to vector<16x512xbf16>
    %c0_29 = arith.constant 0 : index
    %c0_30 = arith.constant 0 : index
    %51 = vector.load %arg3[%c0_29, %c0_30] : memref<1408x128xbf16, #tpu.memory_space<vmem>>, vector<512x128xbf16>
    %cst_31 = arith.constant dense<0.000000e+00> : vector<16x128xf32>
    %52 = tpu.matmul %50, %51, %cst_31 {dimension_numbers = #tpu.dot_dimension_numbers<[1], [0], [0], [1], [0, 0, 1, 1], [], []>} : vector<16x512xbf16>, vector<512x128xbf16>, vector<16x128xf32> -> vector<16x128xf32>
    %cst_32 = arith.constant dense<0.000000e+00> : vector<128xf32>
    %53 = vector.multi_reduction <add>, %52, %cst_32 [0] : vector<16x128xf32> to vector<128xf32>
    %54 = vector.shape_cast %53 : vector<128xf32> to vector<1x128xf32>
    %c64_i32_33 = arith.constant 64 : i32
    %55 = tpu.dynamic_rotate %54 by %c64_i32_33 dim 1 : vector<1x128xf32>, i32 -> vector<1x128xf32>
    %56 = arith.addf %54, %55 : vector<1x128xf32>
    %57 = arith.mulf %52, %52 : vector<16x128xf32>
    %cst_34 = arith.constant dense<0.000000e+00> : vector<128xf32>
    %58 = vector.multi_reduction <add>, %57, %cst_34 [0] : vector<16x128xf32> to vector<128xf32>
    %59 = vector.shape_cast %58 : vector<128xf32> to vector<1x128xf32>
    %c64_i32_35 = arith.constant 64 : i32
    %60 = tpu.dynamic_rotate %59 by %c64_i32_35 dim 1 : vector<1x128xf32>, i32 -> vector<1x128xf32>
    %61 = arith.addf %59, %60 : vector<1x128xf32>
    %cst_36 = arith.constant 3.125000e-02 : f32
    %62 = vector.broadcast %cst_36 : f32 to vector<1x128xf32>
    %63 = arith.mulf %56, %62 : vector<1x128xf32>
    %cst_37 = arith.constant 3.125000e-02 : f32
    %64 = vector.broadcast %cst_37 : f32 to vector<1x128xf32>
    %65 = arith.mulf %61, %64 : vector<1x128xf32>
    %66 = arith.mulf %63, %63 : vector<1x128xf32>
    %67 = arith.subf %65, %66 : vector<1x128xf32>
    %cst_38 = arith.constant 0.000000e+00 : f32
    %68 = vector.broadcast %cst_38 : f32 to vector<1x128xf32>
    %69 = arith.maximumf %67, %68 : vector<1x128xf32>
    %c1_39 = arith.constant 1 : index
    %c0_40 = arith.constant 0 : index
    %70 = vector.load %arg4[%c1_39, %c0_40] : memref<4x128xf32, #tpu.memory_space<vmem>>, vector<1x128xf32>
    %cst_41 = arith.constant 9.99999974E-6 : f32
    %71 = vector.broadcast %cst_41 : f32 to vector<1x128xf32>
    %72 = arith.addf %69, %71 : vector<1x128xf32>
    %73 = math.rsqrt %72 : vector<1x128xf32>
    %74 = arith.mulf %70, %73 : vector<1x128xf32>
    %c1_42 = arith.constant 1 : index
    %c0_43 = arith.constant 0 : index
    %75 = vector.load %arg5[%c1_42, %c0_43] : memref<4x128xf32, #tpu.memory_space<vmem>>, vector<1x128xf32>
    %76 = arith.mulf %63, %74 : vector<1x128xf32>
    %77 = arith.subf %75, %76 : vector<1x128xf32>
    %78 = vector.broadcast %74 : vector<1x128xf32> to vector<16x128xf32>
    %79 = arith.mulf %52, %78 : vector<16x128xf32>
    %80 = vector.broadcast %77 : vector<1x128xf32> to vector<16x128xf32>
    %81 = arith.addf %79, %80 : vector<16x128xf32>
    %cst_44 = arith.constant 0.00999999977 : f32
    %82 = vector.broadcast %cst_44 : f32 to vector<16x128xf32>
    %83 = arith.mulf %82, %81 : vector<16x128xf32>
    %84 = arith.maximumf %81, %83 : vector<16x128xf32>
    %85 = vector.extract_strided_slice %84 {offsets = [0, 0], sizes = [14, 128], strides = [1, 1]} : vector<16x128xf32> to vector<14x128xf32>
    %c2_45 = arith.constant 2 : index
    %c0_46 = arith.constant 0 : index
    %86 = vector.load %arg8[%c2_45, %c0_46] : memref<16x384xf32, #tpu.memory_space<vmem>>, vector<14x128xf32>
    tpu.vector_store %arg8[%c2_45, %c0_46], %85 {strides = array<i32>} : memref<16x384xf32, #tpu.memory_space<vmem>>, vector<14x128xf32>,
    %87 = vector.extract_strided_slice %84 {offsets = [0, 0], sizes = [15, 128], strides = [1, 1]} : vector<16x128xf32> to vector<15x128xf32>
    %c1_47 = arith.constant 1 : index
    %c128_48 = arith.constant 128 : index
    %88 = vector.load %arg8[%c1_47, %c128_48] : memref<16x384xf32, #tpu.memory_space<vmem>>, vector<15x128xf32>
    tpu.vector_store %arg8[%c1_47, %c128_48], %87 {strides = array<i32>} : memref<16x384xf32, #tpu.memory_space<vmem>>, vector<15x128xf32>,
    %c0_49 = arith.constant 0 : index
    %c256_50 = arith.constant 256 : index
    %89 = vector.load %arg8[%c0_49, %c256_50] : memref<16x384xf32, #tpu.memory_space<vmem>>, vector<16x128xf32>
    tpu.vector_store %arg8[%c0_49, %c256_50], %84 {strides = array<i32>} : memref<16x384xf32, #tpu.memory_space<vmem>>, vector<16x128xf32>,
    %c0_51 = arith.constant 0 : index
    %c0_52 = arith.constant 0 : index
    %90 = vector.load %arg8[%c0_51, %c0_52] : memref<16x384xf32, #tpu.memory_space<vmem>>, vector<16x384xf32>
    %91 = arith.truncf %90 : vector<16x384xf32> to vector<16x384xbf16>
    %c512 = arith.constant 512 : index
    %c0_53 = arith.constant 0 : index
    %92 = vector.load %arg3[%c512, %c0_53] : memref<1408x128xbf16, #tpu.memory_space<vmem>>, vector<384x128xbf16>
    %cst_54 = arith.constant dense<0.000000e+00> : vector<16x128xf32>
    %93 = tpu.matmul %91, %92, %cst_54 {dimension_numbers = #tpu.dot_dimension_numbers<[1], [0], [0], [1], [0, 0, 1, 1], [], []>} : vector<16x384xbf16>, vector<384x128xbf16>, vector<16x128xf32> -> vector<16x128xf32>
    %cst_55 = arith.constant dense<0.000000e+00> : vector<128xf32>
    %94 = vector.multi_reduction <add>, %93, %cst_55 [0] : vector<16x128xf32> to vector<128xf32>
    %95 = vector.shape_cast %94 : vector<128xf32> to vector<1x128xf32>
    %c64_i32_56 = arith.constant 64 : i32
    %96 = tpu.dynamic_rotate %95 by %c64_i32_56 dim 1 : vector<1x128xf32>, i32 -> vector<1x128xf32>
    %97 = arith.addf %95, %96 : vector<1x128xf32>
    %98 = arith.mulf %93, %93 : vector<16x128xf32>
    %cst_57 = arith.constant dense<0.000000e+00> : vector<128xf32>
    %99 = vector.multi_reduction <add>, %98, %cst_57 [0] : vector<16x128xf32> to vector<128xf32>
    %100 = vector.shape_cast %99 : vector<128xf32> to vector<1x128xf32>
    %c64_i32_58 = arith.constant 64 : i32
    %101 = tpu.dynamic_rotate %100 by %c64_i32_58 dim 1 : vector<1x128xf32>, i32 -> vector<1x128xf32>
    %102 = arith.addf %100, %101 : vector<1x128xf32>
    %cst_59 = arith.constant 3.125000e-02 : f32
    %103 = vector.broadcast %cst_59 : f32 to vector<1x128xf32>
    %104 = arith.mulf %97, %103 : vector<1x128xf32>
    %cst_60 = arith.constant 3.125000e-02 : f32
    %105 = vector.broadcast %cst_60 : f32 to vector<1x128xf32>
    %106 = arith.mulf %102, %105 : vector<1x128xf32>
    %107 = arith.mulf %104, %104 : vector<1x128xf32>
    %108 = arith.subf %106, %107 : vector<1x128xf32>
    %cst_61 = arith.constant 0.000000e+00 : f32
    %109 = vector.broadcast %cst_61 : f32 to vector<1x128xf32>
    %110 = arith.maximumf %108, %109 : vector<1x128xf32>
    %c2_62 = arith.constant 2 : index
    %c0_63 = arith.constant 0 : index
    %111 = vector.load %arg4[%c2_62, %c0_63] : memref<4x128xf32, #tpu.memory_space<vmem>>, vector<1x128xf32>
    %cst_64 = arith.constant 9.99999974E-6 : f32
    %112 = vector.broadcast %cst_64 : f32 to vector<1x128xf32>
    %113 = arith.addf %110, %112 : vector<1x128xf32>
    %114 = math.rsqrt %113 : vector<1x128xf32>
    %115 = arith.mulf %111, %114 : vector<1x128xf32>
    %c2_65 = arith.constant 2 : index
    %c0_66 = arith.constant 0 : index
    %116 = vector.load %arg5[%c2_65, %c0_66] : memref<4x128xf32, #tpu.memory_space<vmem>>, vector<1x128xf32>
    %117 = arith.mulf %104, %115 : vector<1x128xf32>
    %118 = arith.subf %116, %117 : vector<1x128xf32>
    %119 = vector.broadcast %115 : vector<1x128xf32> to vector<16x128xf32>
    %120 = arith.mulf %93, %119 : vector<16x128xf32>
    %121 = vector.broadcast %118 : vector<1x128xf32> to vector<16x128xf32>
    %122 = arith.addf %120, %121 : vector<16x128xf32>
    %cst_67 = arith.constant 0.00999999977 : f32
    %123 = vector.broadcast %cst_67 : f32 to vector<16x128xf32>
    %124 = arith.mulf %123, %122 : vector<16x128xf32>
    %125 = arith.maximumf %122, %124 : vector<16x128xf32>
    %126 = vector.extract_strided_slice %125 {offsets = [0, 0], sizes = [13, 128], strides = [1, 1]} : vector<16x128xf32> to vector<13x128xf32>
    %c3 = arith.constant 3 : index
    %c0_68 = arith.constant 0 : index
    %127 = vector.load %arg9[%c3, %c0_68] : memref<16x512xf32, #tpu.memory_space<vmem>>, vector<13x128xf32>
    tpu.vector_store %arg9[%c3, %c0_68], %126 {strides = array<i32>} : memref<16x512xf32, #tpu.memory_space<vmem>>, vector<13x128xf32>,
    %128 = vector.extract_strided_slice %125 {offsets = [0, 0], sizes = [14, 128], strides = [1, 1]} : vector<16x128xf32> to vector<14x128xf32>
    %c2_69 = arith.constant 2 : index
    %c128_70 = arith.constant 128 : index
    %129 = vector.load %arg9[%c2_69, %c128_70] : memref<16x512xf32, #tpu.memory_space<vmem>>, vector<14x128xf32>
    tpu.vector_store %arg9[%c2_69, %c128_70], %128 {strides = array<i32>} : memref<16x512xf32, #tpu.memory_space<vmem>>, vector<14x128xf32>,
    %130 = vector.extract_strided_slice %125 {offsets = [0, 0], sizes = [15, 128], strides = [1, 1]} : vector<16x128xf32> to vector<15x128xf32>
    %c1_71 = arith.constant 1 : index
    %c256_72 = arith.constant 256 : index
    %131 = vector.load %arg9[%c1_71, %c256_72] : memref<16x512xf32, #tpu.memory_space<vmem>>, vector<15x128xf32>
    tpu.vector_store %arg9[%c1_71, %c256_72], %130 {strides = array<i32>} : memref<16x512xf32, #tpu.memory_space<vmem>>, vector<15x128xf32>,
    %c0_73 = arith.constant 0 : index
    %c384_74 = arith.constant 384 : index
    %132 = vector.load %arg9[%c0_73, %c384_74] : memref<16x512xf32, #tpu.memory_space<vmem>>, vector<16x128xf32>
    tpu.vector_store %arg9[%c0_73, %c384_74], %125 {strides = array<i32>} : memref<16x512xf32, #tpu.memory_space<vmem>>, vector<16x128xf32>,
    %c0_75 = arith.constant 0 : index
    %c0_76 = arith.constant 0 : index
    %133 = vector.load %arg9[%c0_75, %c0_76] : memref<16x512xf32, #tpu.memory_space<vmem>>, vector<16x512xf32>
    %134 = arith.truncf %133 : vector<16x512xf32> to vector<16x512xbf16>
    %c896 = arith.constant 896 : index
    %c0_77 = arith.constant 0 : index
    %135 = vector.load %arg3[%c896, %c0_77] : memref<1408x128xbf16, #tpu.memory_space<vmem>>, vector<512x128xbf16>
    %cst_78 = arith.constant dense<0.000000e+00> : vector<16x128xf32>
    %136 = tpu.matmul %134, %135, %cst_78 {dimension_numbers = #tpu.dot_dimension_numbers<[1], [0], [0], [1], [0, 0, 1, 1], [], []>} : vector<16x512xbf16>, vector<512x128xbf16>, vector<16x128xf32> -> vector<16x128xf32>
    %cst_79 = arith.constant dense<0.000000e+00> : vector<128xf32>
    %137 = vector.multi_reduction <add>, %136, %cst_79 [0] : vector<16x128xf32> to vector<128xf32>
    %138 = vector.shape_cast %137 : vector<128xf32> to vector<1x128xf32>
    %c64_i32_80 = arith.constant 64 : i32
    %139 = tpu.dynamic_rotate %138 by %c64_i32_80 dim 1 : vector<1x128xf32>, i32 -> vector<1x128xf32>
    %140 = arith.addf %138, %139 : vector<1x128xf32>
    %141 = arith.mulf %136, %136 : vector<16x128xf32>
    %cst_81 = arith.constant dense<0.000000e+00> : vector<128xf32>
    %142 = vector.multi_reduction <add>, %141, %cst_81 [0] : vector<16x128xf32> to vector<128xf32>
    %143 = vector.shape_cast %142 : vector<128xf32> to vector<1x128xf32>
    %c64_i32_82 = arith.constant 64 : i32
    %144 = tpu.dynamic_rotate %143 by %c64_i32_82 dim 1 : vector<1x128xf32>, i32 -> vector<1x128xf32>
    %145 = arith.addf %143, %144 : vector<1x128xf32>
    %cst_83 = arith.constant 3.125000e-02 : f32
    %146 = vector.broadcast %cst_83 : f32 to vector<1x128xf32>
    %147 = arith.mulf %140, %146 : vector<1x128xf32>
    %cst_84 = arith.constant 3.125000e-02 : f32
    %148 = vector.broadcast %cst_84 : f32 to vector<1x128xf32>
    %149 = arith.mulf %145, %148 : vector<1x128xf32>
    %150 = arith.mulf %147, %147 : vector<1x128xf32>
    %151 = arith.subf %149, %150 : vector<1x128xf32>
    %cst_85 = arith.constant 0.000000e+00 : f32
    %152 = vector.broadcast %cst_85 : f32 to vector<1x128xf32>
    %153 = arith.maximumf %151, %152 : vector<1x128xf32>
    %c3_86 = arith.constant 3 : index
    %c0_87 = arith.constant 0 : index
    %154 = vector.load %arg4[%c3_86, %c0_87] : memref<4x128xf32, #tpu.memory_space<vmem>>, vector<1x128xf32>
    %cst_88 = arith.constant 9.99999974E-6 : f32
    %155 = vector.broadcast %cst_88 : f32 to vector<1x128xf32>
    %156 = arith.addf %153, %155 : vector<1x128xf32>
    %157 = math.rsqrt %156 : vector<1x128xf32>
    %158 = arith.mulf %154, %157 : vector<1x128xf32>
    %c3_89 = arith.constant 3 : index
    %c0_90 = arith.constant 0 : index
    %159 = vector.load %arg5[%c3_89, %c0_90] : memref<4x128xf32, #tpu.memory_space<vmem>>, vector<1x128xf32>
    %160 = arith.mulf %147, %158 : vector<1x128xf32>
    %161 = arith.subf %159, %160 : vector<1x128xf32>
    %162 = vector.broadcast %158 : vector<1x128xf32> to vector<16x128xf32>
    %163 = arith.mulf %136, %162 : vector<16x128xf32>
    %164 = vector.broadcast %161 : vector<1x128xf32> to vector<16x128xf32>
    %165 = arith.addf %163, %164 : vector<16x128xf32>
    %cst_91 = arith.constant 0.00999999977 : f32
    %166 = vector.broadcast %cst_91 : f32 to vector<16x128xf32>
    %167 = arith.mulf %166, %165 : vector<16x128xf32>
    %168 = arith.maximumf %165, %167 : vector<16x128xf32>
    %c0_92 = arith.constant 0 : index
    %c0_93 = arith.constant 0 : index
    %169 = vector.load %arg6[%c0_92, %c0_93] : memref<16x128xf32, #tpu.memory_space<vmem>>, vector<16x128xf32>
    tpu.vector_store %arg6[%c0_92, %c0_93], %168 {strides = array<i32>} : memref<16x128xf32, #tpu.memory_space<vmem>>, vector<16x128xf32>,
    return
  }
  func.func @transform_0(%arg0: i32) -> (i32, i32) {
    %c0_i32 = arith.constant 0 : i32
    %c0_i32_0 = arith.constant 0 : i32
    %c0_i32_1 = arith.constant 0 : i32
    return %c0_i32, %c0_i32_0 : i32, i32
  }
  func.func @transform_1(%arg0: i32) -> (i32, i32) {
    %c0_i32 = arith.constant 0 : i32
    %c0_i32_0 = arith.constant 0 : i32
    %c0_i32_1 = arith.constant 0 : i32
    return %c0_i32, %c0_i32_0 : i32, i32
  }
  func.func @transform_2(%arg0: i32) -> (i32, i32) {
    %c0_i32 = arith.constant 0 : i32
    %c0_i32_0 = arith.constant 0 : i32
    %c0_i32_1 = arith.constant 0 : i32
    return %c0_i32, %c0_i32_0 : i32, i32
  }
  func.func @transform_3(%arg0: i32) -> (i32, i32) {
    %c0_i32 = arith.constant 0 : i32
    %c0_i32_0 = arith.constant 0 : i32
    %c0_i32_1 = arith.constant 0 : i32
    return %c0_i32, %c0_i32_0 : i32, i32
  }
  func.func @transform_4(%arg0: i32) -> (i32, i32) {
    %c0_i32 = arith.constant 0 : i32
    %c0_i32_0 = arith.constant 0 : i32
    %c0_i32_1 = arith.constant 0 : i32
    return %c0_i32, %c0_i32_0 : i32, i32
  }
  func.func @transform_5(%arg0: i32) -> (i32, i32) {
    %c0_i32 = arith.constant 0 : i32
    %c0_i32_0 = arith.constant 0 : i32
    %c0_i32_1 = arith.constant 0 : i32
    return %c0_i32, %c0_i32_0 : i32, i32
  }
}

</mosaic_0001>

<bundles_post_ra>
// kernel: tile.14
= control target key start
LH: loop header
LB: loop body
LE: loop exit
PB: predicated region body
PF: predicated region fallthrough
CT: control target
= control target key end

     0   :  { %vm19_vm0 = vcmask 523264   ;;  %vm25_vm1 = vcmask 1048064   ;;  %s63_s0 = inlined_call_operand.vmem [shape: f32[4,2,64], index: 0, kind: input, shape index: {}]   ;;  %s64_s1 = inlined_call_operand.vmem [shape: f32[4,128], index: 1, kind: output, shape index: {}]  }
   0x1   :  { %v33_v0 = vld [vmem:[%s63_s0 + $0x6] sm:$0x3]  ;;  %v34_v1 = vld [vmem:[%s63_s0 + $0x4] sm:$0x3]  ;;  %v35_v2 = vld [vmem:[%s63_s0 + $0x2] sm:$0x3] }
   0x2   :  { %7 = vst [vmem:[#allocation1 + $0x18] sm:$0x3] %v33_v0  ;;  %v16_v3 = vld [vmem:[%s63_s0] sm:$0x3]  ;;  %s37_s0 = smov 64  }
   0x3   :  { %11 = vst [vmem:[#allocation1 + $0x10] sm:$0x3] %v34_v1 }
   0x4   :  { %15 = vst [vmem:[#allocation1 + $0x8] sm:$0x3] %v35_v2 }
   0x5   :  { %17 = vst [vmem:[#allocation1] sm:$0x3] %v16_v3 }
   0xc   :  { %v22_v4 = vld [vmem:[#allocation1 + $0x1] ss:$8 sm:$0xf]   ;;  %v18_v5 = vld [vmem:[#allocation1] ss:$8 sm:$0xf]  }
   0xd   :  { %23 = vrot.lane.b32.xlu0 %v22_v4, %s37_s0  ;;  %20 = vst.msk [vmem:[#allocation0] sm:$0xf] %vm19_vm0, %v18_v5  }
  0x7f   :  { %v24_v6 = vpop.permute.xlu0 %23  }
  0x80   :  { %26 = vst.msk [vmem:[#allocation0] sm:$0xf] %vm25_vm1, %v24_v6  }
  0x87   :  { %v29_v7 = vld [vmem:[#allocation0] sm:$0xf] }
  0x88   :  { %32 = vst [vmem:[%s64_s1] sm:$0xf] %v29_v7 }

// kernel: encoder_forward.1
= control target key start
LH: loop header
LB: loop body
LE: loop exit
PB: predicated region body
PF: predicated region fallthrough
CT: control target
= control target key end

     0   :  { %vm65_vm0 = vcmask 130048   ;;  %v1755_v29 = vmov 0.0   ;;  %vm160_vm4 = vcmask 1041408   ;;  %vm170_vm5 = vcmask 1040384   ;;  %s2162_s1 = inlined_call_operand.vmem [shape: bf16[16,128], index: 1, kind: input, shape index: {}]   ;;  %s2163_s0 = inlined_call_operand.vmem [shape: bf16[32,16], index: 0, kind: input, shape index: {}]   ;;  %s2164_s2 = inlined_call_operand.vmem [shape: bf16[1408,128], index: 2, kind: input, shape index: {}]   ;;  %s2165_s3 = inlined_call_operand.vmem [shape: f32[4,128], index: 3, kind: input, shape index: {}]   ;;  %s2166_s4 = inlined_call_operand.vmem [shape: f32[4,128], index: 4, kind: input, shape index: {}]   ;;  %s2167_s5 = inlined_call_operand.vmem [shape: f32[16,128], index: 5, kind: output, shape index: {}]  }
   0x1   :  { %v1655_v0 = vld [vmem:[%s2162_s1] sm:$0xff]  ;;  %v1654_v2 = vld [vmem:[%s2163_s0 + $0x8] sm:$0xff]  ;;  %21 = vst [vmem:[#allocation2 + $0x30] sm:$0xff] %v1755_v29  ;;  %v1687_v30 = vld [vmem:[%s2164_s2 + $0xf8] sm:$0xff]  ;;  %vm880_vm12 = vcmask 1042432  }
   0x2   :  { %v1653_v1 = vld [vmem:[%s2163_s0] sm:$0xff]  ;;  %79 = vmatpush.bf16.msra.mxu0 %v1655_v0  ;;  %s1754_s0 = smov 64   ;;  %22 = vst [vmem:[#allocation2] sm:$0xff] %v1755_v29  ;;  %v1686_v31 = vld [vmem:[%s2164_s2 + $0xf0] sm:$0xff]  ;;  %v1685_v33 = vld [vmem:[%s2164_s2 + $0xe8] sm:$0xff] }
   0x3   :  { %23 = vst [vmem:[#allocation2 + $0x18] sm:$0xff] %v1755_v29  ;;  %v1663_v34 = vld [vmem:[%s2164_s2 + $0x38] sm:$0xff]  ;;  %v1684_v38 = vld [vmem:[%s2164_s2 + $0xe0] sm:$0xff]  ;;  %v1662_v39 = vld [vmem:[%s2164_s2 + $0x30] sm:$0xff] }
   0x4   :  { %29 = vst [vmem:[#allocation3] sm:$0xff] %v1755_v29  ;;  %v1671_v35 = vld [vmem:[%s2164_s2 + $0x78] sm:$0xff]  ;;  %455 = vmatpush.bf16.msra.mxu1 %v1663_v34  ;;  %v1670_v40 = vld [vmem:[%s2164_s2 + $0x70] sm:$0xff]  ;;  %v1661_v46 = vld [vmem:[%s2164_s2 + $0x28] sm:$0xff] }
   0x5   :  { %1299 = vmatmul.msk.bf16.vlgmr.msra.gmra.mxu0 %vm65_vm0, %v1653_v1  ;;  %30 = vst [vmem:[#allocation3 + $0x18] sm:$0xff] %v1755_v29  ;;  %v1679_v36 = vld [vmem:[%s2164_s2 + $0xb8] sm:$0xff]  ;;  %469 = vmatpush.bf16.msra.mxu2 %v1671_v35  ;;  %v1678_v41 = vld [vmem:[%s2164_s2 + $0xb0] sm:$0xff]  ;;  %v1669_v47 = vld [vmem:[%s2164_s2 + $0x68] sm:$0xff] }
   0x6   :  { %35 = vst [vmem:[#allocation4] sm:$0xff] %v1755_v29  ;;  %497 = vmatpush.bf16.msrb.mxu0 %v1687_v30  ;;  %483 = vmatpush.bf16.msra.mxu3 %v1679_v36  ;;  %v1683_v44 = vld [vmem:[%s2164_s2 + $0xd8] sm:$0xff]  ;;  %v1677_v48 = vld [vmem:[%s2164_s2 + $0xa8] sm:$0xff]  ;;  %v1682_v51 = vld [vmem:[%s2164_s2 + $0xd0] sm:$0xff] }
   0x7   :  { %36 = vst [vmem:[#allocation4 + $0x8] sm:$0xff] %v1755_v29  ;;  %v1660_v53 = vld [vmem:[%s2164_s2 + $0x20] sm:$0xff]  ;;  %v1681_v57 = vld [vmem:[%s2164_s2 + $0xc8] sm:$0xff]  ;;  %v1659_v59 = vld [vmem:[%s2164_s2 + $0x18] sm:$0xff] }
   0x8   :  { %37 = vst [vmem:[#allocation4 + $0x38] sm:$0xff] %v1755_v29  ;;  %456 = vmatpush.bf16.msra.mxu1 %v1662_v39  ;;  %v1668_v54 = vld [vmem:[%s2164_s2 + $0x60] sm:$0xff]  ;;  %v1667_v60 = vld [vmem:[%s2164_s2 + $0x58] sm:$0xff]  ;;  %v1658_v63 = vld [vmem:[%s2164_s2 + $0x10] sm:$0xff] }
   0x9   :  { %470 = vmatpush.bf16.msra.mxu2 %v1670_v40  ;;  %v1676_v55 = vld [vmem:[%s2164_s2 + $0xa0] sm:$0xff]  ;;  %v1675_v61 = vld [vmem:[%s2164_s2 + $0x98] sm:$0xff]  ;;  %v1666_v0 = vld [vmem:[%s2164_s2 + $0x50] sm:$0xff] }
   0xa   :  { %498 = vmatpush.bf16.msrb.mxu0 %v1686_v31  ;;  %484 = vmatpush.bf16.msra.mxu3 %v1678_v41  ;;  %v1680_v62 = vld [vmem:[%s2164_s2 + $0xc0] sm:$0xff]  ;;  %v1674_v1 = vld [vmem:[%s2164_s2 + $0x90] sm:$0xff] }
   0xc   :  { %457 = vmatpush.bf16.msra.mxu1 %v1661_v46 }
   0xd   :  { %471 = vmatpush.bf16.msra.mxu2 %v1669_v47 }
   0xe   :  { %499 = vmatpush.bf16.msrb.mxu0 %v1685_v33  ;;  %485 = vmatpush.bf16.msra.mxu3 %v1677_v48 }
  0x10   :  { %458 = vmatpush.bf16.msra.mxu1 %v1660_v53 }
  0x11   :  { %472 = vmatpush.bf16.msra.mxu2 %v1668_v54 }
  0x12   :  { %500 = vmatpush.bf16.msrb.mxu0 %v1684_v38  ;;  %486 = vmatpush.bf16.msra.mxu3 %v1676_v55 }
  0x14   :  { %459 = vmatpush.bf16.msra.mxu1 %v1659_v59 }
  0x15   :  { %1300 = vmatmul.msk.bf16.gmra.mxu0 %vm65_vm0, %v1654_v2  ;;  %473 = vmatpush.bf16.msra.mxu2 %v1667_v60 }
  0x16   :  { %501 = vmatpush.bf16.msrb.mxu0 %v1683_v44  ;;  %487 = vmatpush.bf16.msra.mxu3 %v1675_v61 }
  0x18   :  { %460 = vmatpush.bf16.msra.mxu1 %v1658_v63 }
  0x19   :  { %474 = vmatpush.bf16.msra.mxu2 %v1666_v0 }
  0x1a   :  { %502 = vmatpush.bf16.msrb.mxu0 %v1682_v51  ;;  %488 = vmatpush.bf16.msra.mxu3 %v1674_v1 }
  0x1e   :  { %503 = vmatpush.bf16.msrb.mxu0 %v1681_v57 }
  0x22   :  { %504 = vmatpush.bf16.msrb.mxu0 %v1680_v62 }
  0x82   :  { %v1795_v3 = vpop.f32.mrf.mxu0 }
  0x83   :  { %v103_v7 = vmul.f32 %v1795_v3, %v1795_v3 }
  0x8a   :  { %v1797_v4 = vpop.f32.mrf.mxu0 }
  0x8b   :  { %v104_v6 = vmul.f32 %v1797_v4, %v1797_v4  ;;  %v91_v8 = vadd.f32 %v1797_v4, %v1795_v3 }
  0x8d   :  { %v107_v10 = vadd.f32 %v104_v6, %v103_v7  ;;  %v1657_v7 = vld [vmem:[%s2164_s2 + $0x8] sm:$0xff] }
  0x8e   :  { %461 = vmatpush.bf16.msra.mxu1 %v1657_v7 }
  0x92   :  { %v1799_v5 = vpop.f32.mrf.mxu0 }
  0x93   :  { %v105_v9 = vmul.f32 %v1799_v5, %v1799_v5  ;;  %v92_v11 = vadd.f32 %v91_v8, %v1799_v5  ;;  %v1665_v8 = vld [vmem:[%s2164_s2 + $0x48] sm:$0xff] }
  0x94   :  { %475 = vmatpush.bf16.msra.mxu2 %v1665_v8 }
  0x95   :  { %v108_v13 = vadd.f32 %v107_v10, %v105_v9  ;;  %v1673_v9 = vld [vmem:[%s2164_s2 + $0x88] sm:$0xff] }
  0x96   :  { %489 = vmatpush.bf16.msra.mxu3 %v1673_v9 }
  0x9a   :  { %v1810_v12 = vpop.f32.mrf.mxu0 }
  0x9b   :  { %v93_v14 = vadd.f32 %v92_v11, %v1810_v12  ;;  %v106_v15 = vmul.f32 %v1810_v12, %v1810_v12  ;;  %v1656_v11 = vld [vmem:[%s2164_s2] sm:$0xff] }
  0x9c   :  { %462 = vmatpush.bf16.msra.mxu1 %v1656_v11 }
  0x9d   :  { %v94_v16 = vrot.slane %v93_v14, 4  ;;  %v109_v17 = vadd.f32 %v108_v13, %v106_v15  ;;  %v1664_v13 = vld [vmem:[%s2164_s2 + $0x40] sm:$0xff] }
  0x9e   :  { %476 = vmatpush.bf16.msra.mxu2 %v1664_v13 }
  0x9f   :  { %v110_v18 = vrot.slane %v109_v17, 4  ;;  %v95_v19 = vadd.f32 %v94_v16, %v93_v14  ;;  %v1672_v14 = vld [vmem:[%s2164_s2 + $0x80] sm:$0xff] }
  0xa0   :  { %490 = vmatpush.bf16.msra.mxu3 %v1672_v14 }
  0xa1   :  { %v111_v20 = vadd.f32 %v110_v18, %v109_v17  ;;  %v96_v21 = vrot.slane %v95_v19, 2  ;;  %v124_v17 = vld [vmem:[%s2165_s3] sm:$0x1] }
  0xa3   :  { %v97_v22 = vadd.f32 %v96_v21, %v95_v19  ;;  %v112_v23 = vrot.slane %v111_v20, 2  ;;  %v137_v21 = vld [vmem:[%s2166_s4] sm:$0x1] }
  0xa5   :  { %v98_v24 = vrot.slane %v97_v22, 1  ;;  %v113_v26 = vadd.f32 %v112_v23, %v111_v20 }
  0xa7   :  { %v99_v25 = vadd.f32 %v98_v24, %v97_v22  ;;  %v114_v27 = vrot.slane %v113_v26, 1 }
  0xa9   :  { %100 = vrot.lane.b32.xlu0 %v99_v25, %s1754_s0  ;;  %v115_v28 = vadd.f32 %v114_v27, %v113_v26 }
  0xb1   :  { %116 = vrot.lane.b32.xlu0 %v115_v28, %s1754_s0 }
 0x11b   :  { %v101_v32 = vpop.permute.xlu0 %100 }
 0x11c   :  { %v102_v37 = vadd.f32 %v101_v32, %v99_v25 }
 0x11e   :  { %v1847_v42 = vmul.f32 0.015625, %v102_v37 }
 0x120   :  { %v121_v49 = vmul.f32 %v1847_v42, %v1847_v42 }
 0x123   :  { %v117_v43 = vpop.permute.xlu0 %116 }
 0x124   :  { %v118_v45 = vadd.f32 %v117_v43, %v115_v28 }
 0x126   :  { %v120_v50 = vmul.f32 0.015625, %v118_v45 }
 0x128   :  { %v122_v52 = vsub.f32 %v120_v50, %v121_v49 }
 0x12a   :  { %v123_v56 = vmax.f32 %v122_v52, 0.0 }
 0x12c   :  { %v125_v58 = vadd.f32 1e-05, %v123_v56 }
 0x12e   :  { %1746 = vrsqrt.f32 %v125_v58  ;;  %vm132_vm2 = vweird.f32 %v125_v58 }
 0x134   :  { %v1747_v2 = vpop.eup %1746 }
 0x135   :  { %v127_v6 = vmul.f32 %v1747_v2, %v125_v58  ;;  %vm133_vm1 = vweird.f32 %v1747_v2 }
 0x136   :  { %vm134_vm3 = vmor %vm132_vm2, %vm133_vm1 }
 0x137   :  { %v128_v10 = vmul.f32 %v1747_v2, %v127_v6 }
 0x139   :  { %v129_v15 = vmul.f32 0.5, %v128_v10 }
 0x13b   :  { %v130_v16 = vsub.f32 1.5, %v129_v15 }
 0x13d   :  { %v131_v18 = vmul.f32 %v1747_v2, %v130_v16 }
 0x13f   :  { %v135_v19 = vsel %vm134_vm3, %v1747_v2, %v131_v18 }
 0x140   :  { %v136_v20 = vmul.f32 %v135_v19, %v124_v17 }
 0x142   :  { %v138_v22 = vmul.f32 %v136_v20, %v1847_v42  ;;  %v140_v23 = vperm.slane %v136_v20, 0 }
 0x144   :  { %v139_v24 = vsub.f32 %v137_v21, %v138_v22  ;;  %v141_v25 = vmul.f32 %v140_v23, %v1795_v3  ;;  %v142_v26 = vmul.f32 %v140_v23, %v1797_v4  ;;  %v143_v27 = vmul.f32 %v140_v23, %v1799_v5 }
 0x145   :  { %v144_v28 = vmul.f32 %v140_v23, %v1810_v12 }
 0x146   :  { %v145_v29 = vperm.slane %v139_v24, 0  ;;  %v1711_v24 = vld [vmem:[%s2164_s2 + $0x1b8] sm:$0xff] }
 0x147   :  { %811 = vmatpush.bf16.msrb.mxu3 %v1711_v24 }
 0x148   :  { %v146_v30 = vadd.f32 %v145_v29, %v141_v25  ;;  %v147_v31 = vadd.f32 %v145_v29, %v142_v26  ;;  %v148_v32 = vadd.f32 %v145_v29, %v143_v27  ;;  %v149_v33 = vadd.f32 %v145_v29, %v144_v28  ;;  %v1710_v25 = vld [vmem:[%s2164_s2 + $0x1b0] sm:$0xff]  ;;  %v1709_v26 = vld [vmem:[%s2164_s2 + $0x1a8] sm:$0xff]  ;;  %v1695_v28 = vld [vmem:[%s2164_s2 + $0x138] sm:$0xff] }
 0x149   :  { %v1703_v29 = vld [vmem:[%s2164_s2 + $0x178] sm:$0xff]  ;;  %783 = vmatpush.bf16.msrb.mxu1 %v1695_v28 }
 0x14a   :  { %v150_v34 = vmul.f32 0.01, %v146_v30  ;;  %v151_v35 = vmul.f32 0.01, %v147_v31  ;;  %v152_v36 = vmul.f32 0.01, %v148_v32  ;;  %797 = vmatpush.bf16.msrb.mxu2 %v1703_v29 }
 0x14b   :  { %v153_v37 = vmul.f32 0.01, %v149_v33  ;;  %812 = vmatpush.bf16.msrb.mxu3 %v1710_v25 }
 0x14c   :  { %v154_v38 = vmax.f32 %v146_v30, %v150_v34  ;;  %v155_v39 = vmax.f32 %v147_v31, %v151_v35  ;;  %v156_v40 = vmax.f32 %v148_v32, %v152_v36  ;;  %v1708_v30 = vld [vmem:[%s2164_s2 + $0x1a0] sm:$0xff]  ;;  %v1694_v32 = vld [vmem:[%s2164_s2 + $0x130] sm:$0xff]  ;;  %v1707_v34 = vld [vmem:[%s2164_s2 + $0x198] sm:$0xff] }
 0x14d   :  { %v157_v3 = vmax.f32 %v149_v33, %v153_v37  ;;  %v1702_v33 = vld [vmem:[%s2164_s2 + $0x170] sm:$0xff]  ;;  %784 = vmatpush.bf16.msrb.mxu1 %v1694_v32  ;;  %v1693_v37 = vld [vmem:[%s2164_s2 + $0x128] sm:$0xff] }
 0x14e   :  { %v161_v4 = vrot.slane %v156_v40, 6  ;;  %v171_v41 = vrot.slane %v154_v38, 7  ;;  %v172_v5 = vrot.slane %v155_v39, 7  ;;  %v178_v42 = vrot.slane %v156_v40, 7  ;;  %798 = vmatpush.bf16.msrb.mxu2 %v1702_v33  ;;  %v1706_v40 = vld [vmem:[%s2164_s2 + $0x190] sm:$0xff] }
 0x14f   :  { %v162_v12 = vrot.slane %v157_v3, 6  ;;  %v179_v43 = vrot.slane %v157_v3, 7  ;;  %v198_v44 = vpack.c.bf16 %v155_v39, %v154_v38  ;;  %813 = vmatpush.bf16.msrb.mxu3 %v1709_v26  ;;  %v1701_v38 = vld [vmem:[%s2164_s2 + $0x168] sm:$0xff] }
 0x150   :  { %166 = vst [vmem:[#allocation2 + $0x30] sm:$0xfc] %v161_v4  ;;  %v173_v45 = vsel %vm170_vm5, %v171_v41, %v172_v5  ;;  %v1700_v5 = vld [vmem:[%s2164_s2 + $0x160] sm:$0xff] }
 0x151   :  { %v163_v46 = vsel %vm160_vm4, %v161_v4, %v162_v12  ;;  %176 = vst [vmem:[#allocation2] sm:$0xfe] %v171_v41  ;;  %505 = vmatmul.bf16.vlgmr.msrb.gmra.mxu0 %v198_v44  ;;  %v180_v47 = vsel %vm170_vm5, %v178_v42, %v179_v43  ;;  %785 = vmatpush.bf16.msrb.mxu1 %v1693_v37  ;;  %v1692_v41 = vld [vmem:[%s2164_s2 + $0x120] sm:$0xff]  ;;  %v1705_v12 = vld [vmem:[%s2164_s2 + $0x188] sm:$0xff]  ;;  %v1691_v44 = vld [vmem:[%s2164_s2 + $0x118] sm:$0xff] }
 0x152   :  { %183 = vst [vmem:[#allocation2 + $0x18] sm:$0xfe] %v178_v42  ;;  %799 = vmatpush.bf16.msrb.mxu2 %v1701_v38 }
 0x153   :  { %814 = vmatpush.bf16.msrb.mxu3 %v1708_v30 }
 0x155   :  { %786 = vmatpush.bf16.msrb.mxu1 %v1692_v41 }
 0x156   :  { %800 = vmatpush.bf16.msrb.mxu2 %v1700_v5 }
 0x157   :  { %v187_v48 = vld [vmem:[#allocation2 + $0x30] sm:$0xff]  ;;  %815 = vmatpush.bf16.msrb.mxu3 %v1707_v34 }
 0x158   :  { %v195_v49 = vpack.c.bf16 %v163_v46, %v187_v48  ;;  %v188_v50 = vld [vmem:[#allocation2] sm:$0xff]  ;;  %v1690_v48 = vld [vmem:[%s2164_s2 + $0x110] sm:$0xff] }
 0x159   :  { %v196_v51 = vpack.c.bf16 %v173_v45, %v188_v50  ;;  %v189_v52 = vld [vmem:[#allocation2 + $0x18] sm:$0xff]  ;;  %787 = vmatpush.bf16.msrb.mxu1 %v1691_v44  ;;  %v1689_v50 = vld [vmem:[%s2164_s2 + $0x108] sm:$0xff] }
 0x15a   :  { %463 = vmatmul.bf16.vlgmr.msra.gmra.mxu1 %v195_v49  ;;  %v197_v53 = vpack.c.bf16 %v180_v47, %v189_v52  ;;  %v1699_v45 = vld [vmem:[%s2164_s2 + $0x158] sm:$0xff]  ;;  %v1704_v47 = vld [vmem:[%s2164_s2 + $0x180] sm:$0xff]  ;;  %v1698_v49 = vld [vmem:[%s2164_s2 + $0x150] sm:$0xff] }
 0x15b   :  { %477 = vmatmul.bf16.vlgmr.msra.gmra.mxu2 %v196_v51  ;;  %816 = vmatpush.bf16.msrb.mxu3 %v1706_v40  ;;  %v1697_v51 = vld [vmem:[%s2164_s2 + $0x148] sm:$0xff] }
 0x15c   :  { %491 = vmatmul.bf16.vlgmr.msra.gmra.mxu3 %v197_v53  ;;  %801 = vmatpush.bf16.msrb.mxu2 %v1699_v45 }
 0x15d   :  { %788 = vmatpush.bf16.msrb.mxu1 %v1690_v48 }
 0x15f   :  { %817 = vmatpush.bf16.msrb.mxu3 %v1705_v12 }
 0x160   :  { %802 = vmatpush.bf16.msrb.mxu2 %v1698_v49  ;;  %v1743_v49 = vld [vmem:[%s2164_s2 + $0x2b8] sm:$0xff] }
 0x161   :  { %789 = vmatpush.bf16.msrb.mxu1 %v1689_v50  ;;  %v1742_v50 = vld [vmem:[%s2164_s2 + $0x2b0] sm:$0xff] }
 0x163   :  { %818 = vmatpush.bf16.msrb.mxu3 %v1704_v47 }
 0x164   :  { %803 = vmatpush.bf16.msrb.mxu2 %v1697_v51 }
 0x167   :  { %1214 = vmatpush.bf16.msra.mxu3 %v1743_v49 }
 0x16b   :  { %1215 = vmatpush.bf16.msra.mxu3 %v1742_v50 }
 0x1ce   :  { %v506_v56 = vpop.f32.mrf.mxu0 }
 0x1d6   :  { %v508_v2 = vpop.f32.mrf.mxu0 }
 0x1d7   :  { %v464_v54 = vpop.f32.mrf.mxu1 }
 0x1de   :  { %v478_v55 = vpop.f32.mrf.mxu2 }
 0x1df   :  { %v492_v57 = vpop.f32.mrf.mxu3  ;;  %v479_v58 = vadd.f32 %v478_v55, %v464_v54  ;;  %v466_v60 = vpop.f32.mrf.mxu1  ;;  %v1688_v54 = vld [vmem:[%s2164_s2 + $0x100] sm:$0xff] }
 0x1e0   :  { %v1696_v55 = vld [vmem:[%s2164_s2 + $0x140] sm:$0xff]  ;;  %790 = vmatpush.bf16.msrb.mxu1 %v1688_v54  ;;  %v1727_v54 = vld [vmem:[%s2164_s2 + $0x238] sm:$0xff] }
 0x1e1   :  { %v493_v59 = vadd.f32 %v492_v57, %v479_v58  ;;  %804 = vmatpush.bf16.msrb.mxu2 %v1696_v55  ;;  %v1735_v55 = vld [vmem:[%s2164_s2 + $0x278] sm:$0xff] }
 0x1e3   :  { %v1931_v0 = vadd.f32 %v506_v56, %v493_v59  ;;  %v538_v59 = vld [vmem:[%s2165_s3 + $0x1] sm:$0x1] }
 0x1e4   :  { %1186 = vmatpush.bf16.msra.mxu1 %v1727_v54 }
 0x1e5   :  { %v521_v7 = vmul.f32 %v1931_v0, %v1931_v0  ;;  %1200 = vmatpush.bf16.msra.mxu2 %v1735_v55 }
 0x1e6   :  { %v480_v61 = vpop.f32.mrf.mxu2 }
 0x1e7   :  { %v481_v62 = vadd.f32 %v480_v61, %v466_v60  ;;  %v494_v63 = vpop.f32.mrf.mxu3 }
 0x1e9   :  { %v495_v1 = vadd.f32 %v494_v63, %v481_v62  ;;  %v551_v63 = vld [vmem:[%s2166_s4 + $0x1] sm:$0x1] }
 0x1eb   :  { %v1933_v6 = vadd.f32 %v508_v2, %v495_v1 }
 0x1ed   :  { %v511_v8 = vadd.f32 %v1933_v6, %v1931_v0  ;;  %v522_v9 = vmul.f32 %v1933_v6, %v1933_v6 }
 0x1ef   :  { %v523_v10 = vadd.f32 %v522_v9, %v521_v7  ;;  %v512_v11 = vrot.slane %v511_v8, 4 }
 0x1f1   :  { %v513_v13 = vadd.f32 %v512_v11, %v511_v8  ;;  %v524_v14 = vrot.slane %v523_v10, 4 }
 0x1f3   :  { %v514_v15 = vrot.slane %v513_v13, 2  ;;  %v525_v16 = vadd.f32 %v524_v14, %v523_v10 }
 0x1f5   :  { %v515_v17 = vadd.f32 %v514_v15, %v513_v13  ;;  %v526_v18 = vrot.slane %v525_v16, 2 }
 0x1f7   :  { %v516_v19 = vrot.slane %v515_v17, 1  ;;  %v527_v21 = vadd.f32 %v526_v18, %v525_v16 }
 0x1f9   :  { %v517_v20 = vadd.f32 %v516_v19, %v515_v17  ;;  %v528_v22 = vrot.slane %v527_v21, 1 }
 0x1fb   :  { %518 = vrot.lane.b32.xlu1 %v517_v20, %s1754_s0  ;;  %v529_v23 = vadd.f32 %v528_v22, %v527_v21 }
 0x203   :  { %530 = vrot.lane.b32.xlu1 %v529_v23, %s1754_s0 }
 0x26d   :  { %v519_v27 = vpop.permute.xlu1 %518 }
 0x26e   :  { %v520_v31 = vadd.f32 %v519_v27, %v517_v20 }
 0x270   :  { %v533_v35 = vmul.f32 0.03125, %v520_v31 }
 0x272   :  { %v535_v3 = vmul.f32 %v533_v35, %v533_v35 }
 0x275   :  { %v531_v36 = vpop.permute.xlu1 %530 }
 0x276   :  { %v532_v39 = vadd.f32 %v531_v36, %v529_v23 }
 0x278   :  { %v534_v4 = vmul.f32 0.03125, %v532_v39 }
 0x27a   :  { %v536_v42 = vsub.f32 %v534_v4, %v535_v3 }
 0x27c   :  { %v537_v43 = vmax.f32 %v536_v42, 0.0 }
 0x27e   :  { %v539_v46 = vadd.f32 1e-05, %v537_v43 }
 0x280   :  { %1748 = vrsqrt.f32 %v539_v46  ;;  %vm546_vm7 = vweird.f32 %v539_v46 }
 0x286   :  { %v1749_v52 = vpop.eup %1748 }
 0x287   :  { %v541_v53 = vmul.f32 %v1749_v52, %v539_v46  ;;  %vm547_vm6 = vweird.f32 %v1749_v52 }
 0x288   :  { %vm548_vm8 = vmor %vm546_vm7, %vm547_vm6 }
 0x289   :  { %v542_v56 = vmul.f32 %v1749_v52, %v541_v53  ;;  %v1719_v53 = vld [vmem:[%s2164_s2 + $0x1f8] sm:$0xff] }
 0x28a   :  { %1172 = vmatpush.bf16.msra.mxu0 %v1719_v53 }
 0x28b   :  { %v543_v57 = vmul.f32 0.5, %v542_v56 }
 0x28d   :  { %v544_v58 = vsub.f32 1.5, %v543_v57  ;;  %v1740_v57 = vld [vmem:[%s2164_s2 + $0x2a0] sm:$0xff] }
 0x28f   :  { %v545_v60 = vmul.f32 %v1749_v52, %v544_v58  ;;  %v1718_v58 = vld [vmem:[%s2164_s2 + $0x1f0] sm:$0xff] }
 0x290   :  { %1173 = vmatpush.bf16.msra.mxu0 %v1718_v58 }
 0x291   :  { %v549_v61 = vsel %vm548_vm8, %v1749_v52, %v545_v60  ;;  %v1741_v52 = vld [vmem:[%s2164_s2 + $0x2a8] sm:$0xff]  ;;  %v1734_v60 = vld [vmem:[%s2164_s2 + $0x270] sm:$0xff] }
 0x292   :  { %v550_v62 = vmul.f32 %v549_v61, %v538_v59  ;;  %1216 = vmatpush.bf16.msra.mxu3 %v1741_v52  ;;  %v1726_v59 = vld [vmem:[%s2164_s2 + $0x230] sm:$0xff]  ;;  %1201 = vmatpush.bf16.msra.mxu2 %v1734_v60 }
 0x293   :  { %1187 = vmatpush.bf16.msra.mxu1 %v1726_v59 }
 0x294   :  { %v552_v1 = vmul.f32 %v550_v62, %v533_v35  ;;  %v554_v2 = vperm.slane %v550_v62, 0 }
 0x296   :  { %v553_v7 = vsub.f32 %v551_v63, %v552_v1  ;;  %v555_v8 = vmul.f32 %v554_v2, %v1931_v0  ;;  %v556_v9 = vmul.f32 %v554_v2, %v1933_v6  ;;  %1217 = vmatpush.bf16.msra.mxu3 %v1740_v57  ;;  %v1739_v63 = vld [vmem:[%s2164_s2 + $0x298] sm:$0xff]  ;;  %v1717_v2 = vld [vmem:[%s2164_s2 + $0x1e8] sm:$0xff] }
 0x297   :  { %1174 = vmatpush.bf16.msra.mxu0 %v1717_v2 }
 0x298   :  { %v557_v10 = vperm.slane %v553_v7, 0  ;;  %v1725_v7 = vld [vmem:[%s2164_s2 + $0x228] sm:$0xff] }
 0x299   :  { %1188 = vmatpush.bf16.msra.mxu1 %v1725_v7 }
 0x29a   :  { %v558_v11 = vadd.f32 %v557_v10, %v555_v8  ;;  %v559_v13 = vadd.f32 %v557_v10, %v556_v9  ;;  %v1733_v8 = vld [vmem:[%s2164_s2 + $0x268] sm:$0xff]  ;;  %1218 = vmatpush.bf16.msra.mxu3 %v1739_v63 }
 0x29b   :  { %1202 = vmatpush.bf16.msra.mxu2 %v1733_v8 }
 0x29c   :  { %v560_v14 = vmul.f32 0.01, %v558_v11  ;;  %v561_v15 = vmul.f32 0.01, %v559_v13 }
 0x29e   :  { %v562_v16 = vmax.f32 %v558_v11, %v560_v14  ;;  %v563_v17 = vmax.f32 %v559_v13, %v561_v15  ;;  %v1738_v11 = vld [vmem:[%s2164_s2 + $0x290] sm:$0xff]  ;;  %v1716_v14 = vld [vmem:[%s2164_s2 + $0x1e0] sm:$0xff] }
 0x29f   :  { %v1724_v15 = vld [vmem:[%s2164_s2 + $0x220] sm:$0xff]  ;;  %1219 = vmatpush.bf16.msra.mxu3 %v1738_v11  ;;  %1175 = vmatpush.bf16.msra.mxu0 %v1716_v14 }
 0x2a0   :  { %v566_v18 = vrot.slane %v562_v16, 6  ;;  %v567_v19 = vrot.slane %v563_v17, 6  ;;  %v573_v20 = vrot.slane %v562_v16, 7  ;;  %v574_v21 = vrot.slane %v563_v17, 7  ;;  %1189 = vmatpush.bf16.msra.mxu1 %v1724_v15 }
 0x2a1   :  { %v590_v22 = vpack.c.bf16 %v563_v17, %v562_v16  ;;  %v1732_v16 = vld [vmem:[%s2164_s2 + $0x260] sm:$0xff] }
 0x2a2   :  { %v568_v23 = vsel %vm160_vm4, %v566_v18, %v567_v19  ;;  %571 = vst [vmem:[#allocation3] sm:$0xfc] %v566_v18  ;;  %v575_v24 = vsel %vm170_vm5, %v573_v20, %v574_v21  ;;  %v1737_v18 = vld [vmem:[%s2164_s2 + $0x288] sm:$0xff]  ;;  %1203 = vmatpush.bf16.msra.mxu2 %v1732_v16  ;;  %v1723_v21 = vld [vmem:[%s2164_s2 + $0x218] sm:$0xff] }
 0x2a3   :  { %819 = vmatmul.bf16.vlgmr.msrb.gmra.mxu3 %v590_v22  ;;  %578 = vst [vmem:[#allocation3 + $0x18] sm:$0xfe] %v573_v20  ;;  %v1715_v20 = vld [vmem:[%s2164_s2 + $0x1d8] sm:$0xff] }
 0x2a4   :  { %v1731_v22 = vld [vmem:[%s2164_s2 + $0x258] sm:$0xff]  ;;  %1220 = vmatpush.bf16.msra.mxu3 %v1737_v18  ;;  %1176 = vmatpush.bf16.msra.mxu0 %v1715_v20 }
 0x2a5   :  { %1190 = vmatpush.bf16.msra.mxu1 %v1723_v21 }
 0x2a6   :  { %1204 = vmatpush.bf16.msra.mxu2 %v1731_v22 }
 0x2a9   :  { %v582_v0 = vld [vmem:[#allocation3] sm:$0xff] }
 0x2aa   :  { %v588_v6 = vpack.c.bf16 %v568_v23, %v582_v0  ;;  %v583_v25 = vld [vmem:[#allocation3 + $0x18] sm:$0xff]  ;;  %v1736_v23 = vld [vmem:[%s2164_s2 + $0x280] sm:$0xff]  ;;  %v1722_v0 = vld [vmem:[%s2164_s2 + $0x210] sm:$0xff] }
 0x2ab   :  { %v589_v26 = vpack.c.bf16 %v575_v24, %v583_v25  ;;  %v1714_v24 = vld [vmem:[%s2164_s2 + $0x1d0] sm:$0xff]  ;;  %1221 = vmatpush.bf16.msra.mxu3 %v1736_v23  ;;  %1191 = vmatpush.bf16.msra.mxu1 %v1722_v0 }
 0x2ac   :  { %791 = vmatmul.bf16.vlgmr.msrb.gmra.mxu1 %v588_v6  ;;  %v1730_v6 = vld [vmem:[%s2164_s2 + $0x250] sm:$0xff]  ;;  %1177 = vmatpush.bf16.msra.mxu0 %v1714_v24 }
 0x2ad   :  { %805 = vmatmul.bf16.vlgmr.msrb.gmra.mxu2 %v589_v26 }
 0x2ae   :  { %1205 = vmatpush.bf16.msra.mxu2 %v1730_v6 }
 0x326   :  { %v820_v28 = vpop.f32.mrf.mxu3 }
 0x329   :  { %v792_v27 = vpop.f32.mrf.mxu1 }
 0x32e   :  { %v822_v35 = vpop.f32.mrf.mxu3 }
 0x330   :  { %v806_v29 = vpop.f32.mrf.mxu2 }
 0x331   :  { %v807_v30 = vadd.f32 %v806_v29, %v792_v27  ;;  %v794_v31 = vpop.f32.mrf.mxu1  ;;  %v1713_v27 = vld [vmem:[%s2164_s2 + $0x1c8] sm:$0xff] }
 0x332   :  { %v1729_v29 = vld [vmem:[%s2164_s2 + $0x248] sm:$0xff]  ;;  %1178 = vmatpush.bf16.msra.mxu0 %v1713_v27 }
 0x333   :  { %v2025_v33 = vadd.f32 %v820_v28, %v807_v30  ;;  %v1721_v28 = vld [vmem:[%s2164_s2 + $0x208] sm:$0xff]  ;;  %1206 = vmatpush.bf16.msra.mxu2 %v1729_v29 }
 0x334   :  { %1192 = vmatpush.bf16.msra.mxu1 %v1721_v28 }
 0x335   :  { %v835_v37 = vmul.f32 %v2025_v33, %v2025_v33 }
 0x338   :  { %v808_v32 = vpop.f32.mrf.mxu2 }
 0x339   :  { %v809_v34 = vadd.f32 %v808_v32, %v794_v31  ;;  %v1712_v31 = vld [vmem:[%s2164_s2 + $0x1c0] sm:$0xff] }
 0x33a   :  { %v1720_v32 = vld [vmem:[%s2164_s2 + $0x200] sm:$0xff]  ;;  %1179 = vmatpush.bf16.msra.mxu0 %v1712_v31 }
 0x33b   :  { %v2027_v36 = vadd.f32 %v822_v35, %v809_v34  ;;  %v1728_v34 = vld [vmem:[%s2164_s2 + $0x240] sm:$0xff]  ;;  %1193 = vmatpush.bf16.msra.mxu1 %v1720_v32 }
 0x33c   :  { %1207 = vmatpush.bf16.msra.mxu2 %v1728_v34 }
 0x33d   :  { %v825_v38 = vadd.f32 %v2027_v36, %v2025_v33  ;;  %v836_v39 = vmul.f32 %v2027_v36, %v2027_v36 }
 0x33f   :  { %v837_v40 = vadd.f32 %v836_v39, %v835_v37  ;;  %v826_v3 = vrot.slane %v825_v38, 4 }
 0x341   :  { %v827_v4 = vadd.f32 %v826_v3, %v825_v38  ;;  %v838_v41 = vrot.slane %v837_v40, 4  ;;  %v852_v38 = vld [vmem:[%s2165_s3 + $0x2] sm:$0x1] }
 0x343   :  { %v828_v5 = vrot.slane %v827_v4, 2  ;;  %v839_v42 = vadd.f32 %v838_v41, %v837_v40 }
 0x345   :  { %v829_v12 = vadd.f32 %v828_v5, %v827_v4  ;;  %v840_v43 = vrot.slane %v839_v42, 2  ;;  %v865_v4 = vld [vmem:[%s2166_s4 + $0x2] sm:$0x1] }
 0x347   :  { %v830_v44 = vrot.slane %v829_v12, 1  ;;  %v841_v46 = vadd.f32 %v840_v43, %v839_v42 }
 0x349   :  { %v831_v45 = vadd.f32 %v830_v44, %v829_v12  ;;  %v842_v47 = vrot.slane %v841_v46, 1 }
 0x34b   :  { %832 = vrot.lane.b32.xlu2 %v831_v45, %s1754_s0  ;;  %v843_v48 = vadd.f32 %v842_v47, %v841_v46 }
 0x353   :  { %844 = vrot.lane.b32.xlu2 %v843_v48, %s1754_s0 }
 0x3a5   :  { %v833_v51 = vpop.permute.xlu2 %832 }
 0x3a6   :  { %v834_v56 = vadd.f32 %v833_v51, %v831_v45 }
 0x3a8   :  { %v2067_v61 = vmul.f32 0.03125, %v834_v56 }
 0x3aa   :  { %v849_v9 = vmul.f32 %v2067_v61, %v2067_v61 }
 0x3ad   :  { %v845_v62 = vpop.permute.xlu2 %844 }
 0x3ae   :  { %v846_v1 = vadd.f32 %v845_v62, %v843_v48 }
 0x3b0   :  { %v848_v10 = vmul.f32 0.03125, %v846_v1 }
 0x3b2   :  { %v850_v13 = vsub.f32 %v848_v10, %v849_v9 }
 0x3b4   :  { %v851_v17 = vmax.f32 %v850_v13, 0.0 }
 0x3b6   :  { %v853_v19 = vadd.f32 1e-05, %v851_v17 }
 0x3b8   :  { %1750 = vrsqrt.f32 %v853_v19  ;;  %vm860_vm10 = vweird.f32 %v853_v19 }
 0x3be   :  { %v1751_v25 = vpop.eup %1750 }
 0x3bf   :  { %v855_v26 = vmul.f32 %v1751_v25, %v853_v19  ;;  %vm861_vm9 = vweird.f32 %v1751_v25 }
 0x3c0   :  { %vm862_vm11 = vmor %vm860_vm10, %vm861_vm9 }
 0x3c1   :  { %v856_v30 = vmul.f32 %v1751_v25, %v855_v26 }
 0x3c3   :  { %v857_v35 = vmul.f32 0.5, %v856_v30 }
 0x3c5   :  { %v858_v37 = vsub.f32 1.5, %v857_v35 }
 0x3c7   :  { %v859_v39 = vmul.f32 %v1751_v25, %v858_v37 }
 0x3c9   :  { %v863_v40 = vsel %vm862_vm11, %v1751_v25, %v859_v39 }
 0x3ca   :  { %v864_v3 = vmul.f32 %v863_v40, %v852_v38 }
 0x3cc   :  { %v866_v41 = vmul.f32 %v864_v3, %v2067_v61  ;;  %v868_v5 = vperm.slane %v864_v3, 0 }
 0x3ce   :  { %v867_v42 = vsub.f32 %v865_v4, %v866_v41  ;;  %v869_v12 = vmul.f32 %v868_v5, %v2025_v33  ;;  %v870_v43 = vmul.f32 %v868_v5, %v2027_v36 }
 0x3d0   :  { %v871_v44 = vperm.slane %v867_v42, 0 }
 0x3d2   :  { %v872_v45 = vadd.f32 %v871_v44, %v869_v12  ;;  %v873_v46 = vadd.f32 %v871_v44, %v870_v43 }
 0x3d4   :  { %v874_v47 = vmul.f32 0.01, %v872_v45  ;;  %v875_v48 = vmul.f32 0.01, %v873_v46 }
 0x3d6   :  { %v876_v49 = vmax.f32 %v872_v45, %v874_v47  ;;  %v877_v50 = vmax.f32 %v873_v46, %v875_v48  ;;  %v1255_v48 = vld [vmem:[%s2165_s3 + $0x3] sm:$0x1] }
 0x3d8   :  { %v881_v51 = vrot.slane %v876_v49, 5  ;;  %v882_v52 = vrot.slane %v877_v50, 5  ;;  %v888_v53 = vrot.slane %v876_v49, 6  ;;  %v889_v54 = vrot.slane %v877_v50, 6 }
 0x3d9   :  { %v895_v55 = vrot.slane %v876_v49, 7  ;;  %v896_v56 = vrot.slane %v877_v50, 7  ;;  %v915_v57 = vpack.c.bf16 %v877_v50, %v876_v49 }
 0x3da   :  { %v883_v58 = vsel %vm880_vm12, %v881_v51, %v882_v52  ;;  %886 = vst [vmem:[#allocation4] sm:$0xf8] %v881_v51  ;;  %v890_v33 = vsel %vm160_vm4, %v888_v53, %v889_v54  ;;  %v1268_v52 = vld [vmem:[%s2166_s4 + $0x3] sm:$0x1] }
 0x3db   :  { %1222 = vmatmul.bf16.vlgmr.msra.gmra.mxu3 %v915_v57  ;;  %893 = vst [vmem:[#allocation4 + $0x8] sm:$0xfc] %v888_v53  ;;  %v897_v36 = vsel %vm170_vm5, %v895_v55, %v896_v56 }
 0x3dc   :  { %900 = vst [vmem:[#allocation4 + $0x38] sm:$0xfe] %v895_v55 }
 0x3e1   :  { %v904_v59 = vld [vmem:[#allocation4] sm:$0xff] }
 0x3e2   :  { %v912_v60 = vpack.c.bf16 %v883_v58, %v904_v59  ;;  %v905_v61 = vld [vmem:[#allocation4 + $0x8] sm:$0xff] }
 0x3e3   :  { %v913_v62 = vpack.c.bf16 %v890_v33, %v905_v61  ;;  %v906_v63 = vld [vmem:[#allocation4 + $0x38] sm:$0xff] }
 0x3e4   :  { %1180 = vmatmul.bf16.vlgmr.msra.gmra.mxu0 %v912_v60  ;;  %v914_v1 = vpack.c.bf16 %v897_v36, %v906_v63 }
 0x3e5   :  { %1194 = vmatmul.bf16.vlgmr.msra.gmra.mxu1 %v913_v62 }
 0x3e6   :  { %1208 = vmatmul.bf16.vlgmr.msra.gmra.mxu2 %v914_v1 }
 0x45e   :  { %v1223_v8 = vpop.f32.mrf.mxu3 }
 0x461   :  { %v1181_v2 = vpop.f32.mrf.mxu0 }
 0x462   :  { %v1195_v7 = vpop.f32.mrf.mxu1 }
 0x463   :  { %v1196_v10 = vadd.f32 %v1195_v7, %v1181_v2 }
 0x466   :  { %v1225_v19 = vpop.f32.mrf.mxu3 }
 0x469   :  { %v1209_v9 = vpop.f32.mrf.mxu2  ;;  %v1183_v11 = vpop.f32.mrf.mxu0 }
 0x46a   :  { %v1197_v13 = vpop.f32.mrf.mxu1  ;;  %v1210_v14 = vadd.f32 %v1209_v9, %v1196_v10 }
 0x46b   :  { %v1198_v15 = vadd.f32 %v1197_v13, %v1183_v11 }
 0x46c   :  { %v1224_v17 = vadd.f32 %v1223_v8, %v1210_v14 }
 0x46e   :  { %v1238_v21 = vmul.f32 %v1224_v17, %v1224_v17 }
 0x471   :  { %v1211_v16 = vpop.f32.mrf.mxu2 }
 0x472   :  { %v1212_v18 = vadd.f32 %v1211_v16, %v1198_v15 }
 0x474   :  { %v1226_v20 = vadd.f32 %v1225_v19, %v1212_v18 }
 0x476   :  { %v1228_v22 = vadd.f32 %v1226_v20, %v1224_v17  ;;  %v1239_v23 = vmul.f32 %v1226_v20, %v1226_v20 }
 0x478   :  { %v1229_v24 = vrot.slane %v1228_v22, 4  ;;  %v1240_v0 = vadd.f32 %v1239_v23, %v1238_v21 }
 0x47a   :  { %v1230_v6 = vadd.f32 %v1229_v24, %v1228_v22  ;;  %v1241_v25 = vrot.slane %v1240_v0, 4 }
 0x47c   :  { %v1231_v26 = vrot.slane %v1230_v6, 2  ;;  %v1242_v27 = vadd.f32 %v1241_v25, %v1240_v0 }
 0x47e   :  { %v1232_v28 = vadd.f32 %v1231_v26, %v1230_v6  ;;  %v1243_v29 = vrot.slane %v1242_v27, 2 }
 0x480   :  { %v1233_v30 = vrot.slane %v1232_v28, 1  ;;  %v1244_v31 = vadd.f32 %v1243_v29, %v1242_v27 }
 0x482   :  { %v1234_v32 = vadd.f32 %v1233_v30, %v1232_v28  ;;  %v1245_v34 = vrot.slane %v1244_v31, 1 }
 0x484   :  { %1235 = vrot.lane.b32.xlu0 %v1234_v32, %s1754_s0  ;;  %v1246_v35 = vadd.f32 %v1245_v34, %v1244_v31 }
 0x486   :  { %1247 = vrot.lane.b32.xlu1 %v1246_v35, %s1754_s0 }
 0x4f6   :  { %v1236_v37 = vpop.permute.xlu0 %1235 }
 0x4f7   :  { %v1237_v38 = vadd.f32 %v1236_v37, %v1234_v32 }
 0x4f8   :  { %v1248_v39 = vpop.permute.xlu1 %1247 }
 0x4f9   :  { %v1250_v40 = vmul.f32 0.03125, %v1237_v38  ;;  %v1249_v3 = vadd.f32 %v1248_v39, %v1246_v35 }
 0x4fb   :  { %v1252_v4 = vmul.f32 %v1250_v40, %v1250_v40  ;;  %v1251_v41 = vmul.f32 0.03125, %v1249_v3 }
 0x4fd   :  { %v1253_v5 = vsub.f32 %v1251_v41, %v1252_v4 }
 0x4ff   :  { %v1254_v42 = vmax.f32 %v1253_v5, 0.0 }
 0x501   :  { %v1256_v12 = vadd.f32 1e-05, %v1254_v42 }
 0x503   :  { %1752 = vrsqrt.f32 %v1256_v12  ;;  %vm1263_vm14 = vweird.f32 %v1256_v12 }
 0x509   :  { %v1753_v43 = vpop.eup %1752 }
 0x50a   :  { %v1258_v44 = vmul.f32 %v1753_v43, %v1256_v12  ;;  %vm1264_vm13 = vweird.f32 %v1753_v43 }
 0x50b   :  { %vm1265_vm15 = vmor %vm1263_vm14, %vm1264_vm13 }
 0x50c   :  { %v1259_v45 = vmul.f32 %v1753_v43, %v1258_v44 }
 0x50e   :  { %v1260_v46 = vmul.f32 0.5, %v1259_v45 }
 0x510   :  { %v1261_v47 = vsub.f32 1.5, %v1260_v46 }
 0x512   :  { %v1262_v49 = vmul.f32 %v1753_v43, %v1261_v47 }
 0x514   :  { %v1266_v50 = vsel %vm1265_vm15, %v1753_v43, %v1262_v49 }
 0x515   :  { %v1267_v51 = vmul.f32 %v1266_v50, %v1255_v48 }
 0x517   :  { %v1269_v53 = vmul.f32 %v1267_v51, %v1250_v40  ;;  %v1271_v54 = vperm.slane %v1267_v51, 0 }
 0x519   :  { %v1270_v55 = vsub.f32 %v1268_v52, %v1269_v53  ;;  %v1272_v56 = vmul.f32 %v1271_v54, %v1224_v17  ;;  %v1273_v57 = vmul.f32 %v1271_v54, %v1226_v20 }
 0x51b   :  { %v1274_v58 = vperm.slane %v1270_v55, 0 }
 0x51d   :  { %v1275_v33 = vadd.f32 %v1274_v58, %v1272_v56  ;;  %v1276_v36 = vadd.f32 %v1274_v58, %v1273_v57 }
 0x51f   :  { %v1277_v59 = vmul.f32 0.01, %v1275_v33  ;;  %v1278_v60 = vmul.f32 0.01, %v1276_v36 }
 0x521   :  { %v1279_v61 = vmax.f32 %v1275_v33, %v1277_v59  ;;  %v1280_v62 = vmax.f32 %v1276_v36, %v1278_v60 }
 0x523   :  { %1281 = vst [vmem:[%s2167_s5] sm:$0xff] %v1279_v61 }
 0x524   :  { %1282 = vst [vmem:[%s2167_s5 + $0x8] sm:$0xff] %v1280_v62 }

</bundles_post_ra>
